<compile_context>
chip_gen: v6e
topology: v6e:2x2x1
jax: 0.10.0
libtpu: 0.0.40
codegen_flags: <defaults>
</compile_context>

<pallas_src>
import functools

import jax
import jax.numpy as jnp
from jax import lax
from jax.experimental import pallas as pl
from jax.experimental.pallas import tpu as pltpu

_INV_SQRT2 = 0.7071067811865475  # 1/sqrt(2) — exact (erf) GELU, PyTorch default


# ---------------------------------------------------------------------------
# Kernel 1: pooler — Linear(F -> A) + bias + exact GELU.
# x tile is addressed directly out of the [L, B, T, F] array via index_map.
# ---------------------------------------------------------------------------
def _pooler_kernel(x_ref, w_ref, b_ref, o_ref):
    # x_ref: (tt, F); w_ref: (F, A); b_ref: (1, A); o_ref: (tt, A)
    y = jnp.dot(x_ref[...], w_ref[...], preferred_element_type=jnp.float32)
    y = y + b_ref[...]
    o_ref[...] = (0.5 * y * (1.0 + lax.erf(y * _INV_SQRT2))).astype(o_ref.dtype)


def pooler(x, w1_t, b1_2d, *, row_tile):
    """x: (L, B, T, F); w1_t: (F, A); b1_2d: (1, A) -> (B, L, T, A) float32."""
    L, B, T, F = x.shape
    A = w1_t.shape[1]
    assert row_tile % 8 == 0
    tt = min(row_tile, T)
    grid = (B, L, pl.cdiv(T, tt))
    return pl.pallas_call(
        _pooler_kernel,
        out_shape=jax.ShapeDtypeStruct((B, L, T, A), jnp.float32),
        grid_spec=pltpu.PrefetchScalarGridSpec(
            num_scalar_prefetch=0,
            grid=grid,
            in_specs=[
                # permutation (l,b,t) folded into the index_map — no transpose
                pl.BlockSpec((None, None, tt, F), lambda b, l, i: (l, b, i, 0)),
                # weights/bias: constant block index -> DMA'd once, VMEM-resident
                pl.BlockSpec((F, A), lambda b, l, i: (0, 0)),
                pl.BlockSpec((1, A), lambda b, l, i: (0, 0)),
            ],
            out_specs=pl.BlockSpec((None, None, tt, A),
                                   lambda b, l, i: (b, l, i, 0)),
        ),
        compiler_params=pltpu.CompilerParams(
            dimension_semantics=("parallel", "parallel", "parallel")),
    )(x, w1_t, b1_2d)


# ---------------------------------------------------------------------------
# Kernel 2: classification head — tiled (B, K) @ (K, N) + bias.
# ---------------------------------------------------------------------------
def _head_single_kernel(x_ref, w_ref, b_ref, o_ref):
    # Whole K in one block: no accumulator scratch / no second pass needed.
    o_ref[...] = (jnp.dot(x_ref[...], w_ref[...],
                          preferred_element_type=jnp.float32)
                  + b_ref[...]).astype(o_ref.dtype)


def _head_kernel(x_ref, w_ref, b_ref, o_ref, acc_ref):
    k = pl.program_id(1)

    @pl.when(k == 0)
    def _():
        # Fold the bias into the accumulator init (saves the final add).
        acc_ref[...] = jnp.broadcast_to(b_ref[...], acc_ref.shape
                                        ).astype(jnp.float32)

    acc_ref[...] += jnp.dot(x_ref[...], w_ref[...],
                            preferred_element_type=jnp.float32)

    @pl.when(k == pl.num_programs(1) - 1)
    def _():
        o_ref[...] = acc_ref[...].astype(o_ref.dtype)


def head(flat, w2p, b2_2d, *, batch_tile=256, k_tile_max=4096):
    """flat: (B, K); w2p: (K, N); b2_2d: (1, N) -> (B, N) float32."""
    Bq, K = flat.shape
    N = w2p.shape[1]
    tb = min(batch_tile, Bq)

    tk = None
    for cand in (4096, 2048, 1024, 512, 256, 128):
        if cand <= k_tile_max and K % cand == 0:
            tk = cand
            break
    if tk is None:
        if K <= k_tile_max:
            tk = K                      # single K block (K == full dim: legal)
        else:
            tk = 512                    # zero-pad K so the reduction tiles evenly
            pad = (-K) % tk
            flat = jnp.pad(flat, ((0, 0), (0, pad)))
            w2p = jnp.pad(w2p, ((0, pad), (0, 0)))
            K = K + pad

    kt = K // tk
    if kt == 1:
        # Fast path: whole reduction in one tile, no scratch accumulator.
        return pl.pallas_call(
            _head_single_kernel,
            out_shape=jax.ShapeDtypeStruct((Bq, N), jnp.float32),
            grid_spec=pltpu.PrefetchScalarGridSpec(
                num_scalar_prefetch=0,
                grid=(pl.cdiv(Bq, tb),),
                in_specs=[
                    pl.BlockSpec((tb, K), lambda i: (i, 0)),
                    pl.BlockSpec((K, N), lambda i: (0, 0)),
                    pl.BlockSpec((1, N), lambda i: (0, 0)),
                ],
                out_specs=pl.BlockSpec((tb, N), lambda i: (i, 0)),
            ),
            compiler_params=pltpu.CompilerParams(
                dimension_semantics=("parallel",)),
        )(flat, w2p, b2_2d)

    grid = (pl.cdiv(Bq, tb), kt)
    return pl.pallas_call(
        _head_kernel,
        out_shape=jax.ShapeDtypeStruct((Bq, N), jnp.float32),
        grid_spec=pltpu.PrefetchScalarGridSpec(
            num_scalar_prefetch=0,
            grid=grid,
            in_specs=[
                pl.BlockSpec((tb, tk), lambda i, k: (i, k)),
                pl.BlockSpec((tk, N), lambda i, k: (k, 0)),
                pl.BlockSpec((1, N), lambda i, k: (0, 0)),
            ],
            out_specs=pl.BlockSpec((tb, N), lambda i, k: (i, 0)),
            scratch_shapes=[pltpu.VMEM((tb, N), jnp.float32)],
        ),
        compiler_params=pltpu.CompilerParams(
            dimension_semantics=("parallel", "arbitrary")),
    )(flat, w2p, b2_2d)


# ---------------------------------------------------------------------------
# Full AP_GLUE forward.
# ---------------------------------------------------------------------------
@functools.partial(jax.jit, static_argnames=("adapter_dim", "row_tile"))
def ap_glue_forward(x, w1_t, b1, w2_t, b2, *, adapter_dim, row_tile=256):
    L, B, T, F = x.shape
    A = adapter_dim
    N = w2_t.shape[1]
    assert w1_t.shape == (F, A)
    assert w2_t.shape[0] == T * A * L

    # Pooler emits y[b, l, t, a] = GELU(x[l, b, t, :] @ W1.T + b1)[a].
    y = pooler(x, w1_t, b1.reshape(1, A), row_tile=row_tile)   # (B, L, T, A)
    flat = y.reshape(B, L * T * A)                              # free collapse

    # PyTorch flattens the head input in (t, a, l) order; the pooler emits
    # (l, t, a).  Permute W2's rows (weights only, once) to match:
    #   w2p[(l*T + t)*A + a, n] == w2_t[t*A*L + a*L + l, n]
    w2p = w2_t.reshape(T, A, L, N).transpose(2, 0, 1, 3).reshape(L * T * A, N)

    return head(flat, w2p, b2.reshape(1, N))                    # (B, N)


# Pure-JAX reference (mirrors the PyTorch module exactly) for correctness.
def ap_glue_reference(x, w1_t, b1, w2_t, b2, adapter_dim):
    L, B, T, F = x.shape
    A = adapter_dim
    x_rows = jnp.transpose(x, (1, 2, 0, 3)).reshape(B * T * L, F)
    y = jax.nn.gelu(x_rows @ w1_t + b1, approximate=False)
    y = y.reshape(B, T, L, A)
    y = jnp.transpose(y, (0, 1, 3, 2)).reshape(B, T * A * L)
    return y @ w2_t + b2


if __name__ == "__main__":
    # Small, module-consistent shapes.
    n_layers, batch_sz, n_tokens, n_features = 4, 2, 8, 32
    adapter_dim, n_labels = 16, 3

    key = jax.random.PRNGKey(0)
    kx, kw1, kb1, kw2, kb2 = jax.random.split(key, 5)

    # Input: [L, B, T, F]
    x = jax.random.normal(kx, (n_layers, batch_sz, n_tokens, n_features),
                          jnp.float32)

    # Parameters (same shapes as the nn.Linear layers).
    w1 = 0.05 * jax.random.normal(kw1, (adapter_dim, n_features), jnp.float32)
    b1 = 0.01 * jax.random.normal(kb1, (adapter_dim,), jnp.float32)
    flat_dim = n_tokens * adapter_dim * n_layers
    w2 = 0.05 * jax.random.normal(kw2, (n_labels, flat_dim), jnp.float32)
    b2 = 0.01 * jax.random.normal(kb2, (n_labels,), jnp.float32)

    w1_t = w1.T  # (F, A)
    w2_t = w2.T  # (T*A*L, labels)

    out = ap_glue_forward(x, w1_t, b1, w2_t, b2,
                          adapter_dim=adapter_dim, row_tile=256)
    out = jax.block_until_ready(out)

    ref = ap_glue_reference(x, w1_t, b1, w2_t, b2, adapter_dim)
    assert out.shape == (batch_sz, n_labels)
    assert jnp.allclose(out, ref, atol=1e-4, rtol=1e-4)

    print("KERNEL_OK")
</pallas_src>

<mosaic_0001>
module attributes {stable_mosaic.version = 11 : i64} {
  func.func @_pooler_kernel(%arg0: i32, %arg1: i32, %arg2: i32, %arg3: memref<1x1x8x32xf32, #tpu.memory_space<vmem>>, %arg4: memref<32x16xf32, #tpu.memory_space<vmem>>, %arg5: memref<1x16xf32, #tpu.memory_space<vmem>>, %arg6: memref<1x1x8x16xf32, #tpu.memory_space<vmem>>) attributes {dimension_semantics = [#tpu.dimension_semantics<parallel>, #tpu.dimension_semantics<parallel>, #tpu.dimension_semantics<parallel>], iteration_bounds = array<i64: 2, 4, 1>, scalar_prefetch = 0 : i64, scratch_operands = 0 : i64, tpu.core_type = #tpu.core_type<tc>, window_params = [{transform_indices = @transform_0, window_bounds = array<i64: 1, 1, 8, 32>}, {pipeline_mode = #tpu.pipeline_mode<synchronous>, transform_indices = @transform_1, window_bounds = array<i64: 32, 16>}, {pipeline_mode = #tpu.pipeline_mode<synchronous>, transform_indices = @transform_2, window_bounds = array<i64: 1, 16>}, {transform_indices = @transform_3, window_bounds = array<i64: 1, 1, 8, 16>}]} {
    %c0 = arith.constant 0 : index
    %c0_0 = arith.constant 0 : index
    %c0_1 = arith.constant 0 : index
    %c0_2 = arith.constant 0 : index
    %0 = vector.load %arg3[%c0, %c0_0, %c0_1, %c0_2] : memref<1x1x8x32xf32, #tpu.memory_space<vmem>>, vector<1x1x8x32xf32>
    %1 = vector.shape_cast %0 : vector<1x1x8x32xf32> to vector<8x32xf32>
    %c0_3 = arith.constant 0 : index
    %c0_4 = arith.constant 0 : index
    %2 = vector.load %arg4[%c0_3, %c0_4] : memref<32x16xf32, #tpu.memory_space<vmem>>, vector<32x16xf32>
    %cst = arith.constant dense<0.000000e+00> : vector<8x16xf32>
    %3 = tpu.matmul %1, %2, %cst {dimension_numbers = #tpu.dot_dimension_numbers<[1], [0], [0], [1], [0, 0, 1, 1], [], []>} : vector<8x32xf32>, vector<32x16xf32>, vector<8x16xf32> -> vector<8x16xf32>
    %c0_5 = arith.constant 0 : index
    %c0_6 = arith.constant 0 : index
    %4 = vector.load %arg5[%c0_5, %c0_6] : memref<1x16xf32, #tpu.memory_space<vmem>>, vector<1x16xf32>
    %5 = vector.broadcast %4 : vector<1x16xf32> to vector<8x16xf32>
    %6 = arith.addf %3, %5 : vector<8x16xf32>
    %cst_7 = arith.constant 5.000000e-01 : f32
    %7 = vector.broadcast %cst_7 : f32 to vector<8x16xf32>
    %8 = arith.mulf %7, %6 : vector<8x16xf32>
    %cst_8 = arith.constant 0.707106769 : f32
    %9 = vector.broadcast %cst_8 : f32 to vector<8x16xf32>
    %10 = arith.mulf %6, %9 : vector<8x16xf32>
    %11 = math.erf %10 : vector<8x16xf32>
    %cst_9 = arith.constant 1.000000e+00 : f32
    %12 = vector.broadcast %cst_9 : f32 to vector<8x16xf32>
    %13 = arith.addf %12, %11 : vector<8x16xf32>
    %14 = arith.mulf %8, %13 : vector<8x16xf32>
    %c0_10 = arith.constant 0 : index
    %c0_11 = arith.constant 0 : index
    %c0_12 = arith.constant 0 : index
    %c0_13 = arith.constant 0 : index
    %15 = vector.load %arg6[%c0_10, %c0_11, %c0_12, %c0_13] : memref<1x1x8x16xf32, #tpu.memory_space<vmem>>, vector<1x1x8x16xf32>
    %16 = vector.shape_cast %15 : vector<1x1x8x16xf32> to vector<8x16xf32>
    %17 = vector.shape_cast %14 : vector<8x16xf32> to vector<1x1x8x16xf32>
    tpu.vector_store %arg6[%c0_10, %c0_11, %c0_12, %c0_13], %17 {strides = array<i32>} : memref<1x1x8x16xf32, #tpu.memory_space<vmem>>, vector<1x1x8x16xf32>,
    return
  }
  func.func @transform_0(%arg0: i32, %arg1: i32, %arg2: i32) -> (i32, i32, i32, i32) {
    %c0_i32 = arith.constant 0 : i32
    %c0_i32_0 = arith.constant 0 : i32
    return %arg1, %arg0, %arg2, %c0_i32 : i32, i32, i32, i32
  }
  func.func @transform_1(%arg0: i32, %arg1: i32, %arg2: i32) -> (i32, i32) {
    %c0_i32 = arith.constant 0 : i32
    %c0_i32_0 = arith.constant 0 : i32
    %c0_i32_1 = arith.constant 0 : i32
    return %c0_i32, %c0_i32_0 : i32, i32
  }
  func.func @transform_2(%arg0: i32, %arg1: i32, %arg2: i32) -> (i32, i32) {
    %c0_i32 = arith.constant 0 : i32
    %c0_i32_0 = arith.constant 0 : i32
    %c0_i32_1 = arith.constant 0 : i32
    return %c0_i32, %c0_i32_0 : i32, i32
  }
  func.func @transform_3(%arg0: i32, %arg1: i32, %arg2: i32) -> (i32, i32, i32, i32) {
    %c0_i32 = arith.constant 0 : i32
    %c0_i32_0 = arith.constant 0 : i32
    return %arg0, %arg1, %arg2, %c0_i32 : i32, i32, i32, i32
  }
}

module attributes {stable_mosaic.version = 11 : i64} {
  func.func @_head_single_kernel(%arg0: i32, %arg1: memref<2x512xf32, #tpu.memory_space<vmem>>, %arg2: memref<512x3xf32, #tpu.memory_space<vmem>>, %arg3: memref<1x3xf32, #tpu.memory_space<vmem>>, %arg4: memref<2x3xf32, #tpu.memory_space<vmem>>) attributes {dimension_semantics = [#tpu.dimension_semantics<parallel>], iteration_bounds = array<i64: 1>, scalar_prefetch = 0 : i64, scratch_operands = 0 : i64, tpu.core_type = #tpu.core_type<tc>, window_params = [{transform_indices = @transform_0, window_bounds = array<i64: 2, 512>}, {pipeline_mode = #tpu.pipeline_mode<synchronous>, transform_indices = @transform_1, window_bounds = array<i64: 512, 3>}, {pipeline_mode = #tpu.pipeline_mode<synchronous>, transform_indices = @transform_2, window_bounds = array<i64: 1, 3>}, {transform_indices = @transform_3, window_bounds = array<i64: 2, 3>}]} {
    %c0 = arith.constant 0 : index
    %c0_0 = arith.constant 0 : index
    %0 = vector.load %arg1[%c0, %c0_0] : memref<2x512xf32, #tpu.memory_space<vmem>>, vector<2x512xf32>
    %c0_1 = arith.constant 0 : index
    %c0_2 = arith.constant 0 : index
    %1 = vector.load %arg2[%c0_1, %c0_2] : memref<512x3xf32, #tpu.memory_space<vmem>>, vector<512x3xf32>
    %cst = arith.constant dense<0.000000e+00> : vector<2x3xf32>
    %2 = tpu.matmul %0, %1, %cst {dimension_numbers = #tpu.dot_dimension_numbers<[1], [0], [0], [1], [0, 0, 1, 1], [], []>} : vector<2x512xf32>, vector<512x3xf32>, vector<2x3xf32> -> vector<2x3xf32>
    %c0_3 = arith.constant 0 : index
    %c0_4 = arith.constant 0 : index
    %3 = vector.load %arg3[%c0_3, %c0_4] : memref<1x3xf32, #tpu.memory_space<vmem>>, vector<1x3xf32>
    %4 = vector.broadcast %3 : vector<1x3xf32> to vector<2x3xf32>
    %5 = arith.addf %2, %4 : vector<2x3xf32>
    %c0_5 = arith.constant 0 : index
    %c0_6 = arith.constant 0 : index
    %6 = vector.load %arg4[%c0_5, %c0_6] : memref<2x3xf32, #tpu.memory_space<vmem>>, vector<2x3xf32>
    tpu.vector_store %arg4[%c0_5, %c0_6], %5 {strides = array<i32>} : memref<2x3xf32, #tpu.memory_space<vmem>>, vector<2x3xf32>,
    return
  }
  func.func @transform_0(%arg0: i32) -> (i32, i32) {
    %c0_i32 = arith.constant 0 : i32
    %c0_i32_0 = arith.constant 0 : i32
    return %arg0, %c0_i32 : i32, i32
  }
  func.func @transform_1(%arg0: i32) -> (i32, i32) {
    %c0_i32 = arith.constant 0 : i32
    %c0_i32_0 = arith.constant 0 : i32
    %c0_i32_1 = arith.constant 0 : i32
    return %c0_i32, %c0_i32_0 : i32, i32
  }
  func.func @transform_2(%arg0: i32) -> (i32, i32) {
    %c0_i32 = arith.constant 0 : i32
    %c0_i32_0 = arith.constant 0 : i32
    %c0_i32_1 = arith.constant 0 : i32
    return %c0_i32, %c0_i32_0 : i32, i32
  }
  func.func @transform_3(%arg0: i32) -> (i32, i32) {
    %c0_i32 = arith.constant 0 : i32
    %c0_i32_0 = arith.constant 0 : i32
    return %arg0, %c0_i32 : i32, i32
  }
}

</mosaic_0001>

<bundles_post_ra>
// kernel: ap_glue_forward.2
= control target key start
LH: loop header
LB: loop body
LE: loop exit
PB: predicated region body
PF: predicated region fallthrough
CT: control target
= control target key end

     0   :  { %s558_s12 = smov 0   ;;  %s560_s13 = smov 0   ;;  %s624_s0 = inlined_call_operand.vmem [shape: f32[4,2,8,32], index: 0, kind: input, shape index: {}]   ;;  %s625_s1 = inlined_call_operand.vmem [shape: f32[32,16], index: 1, kind: input, shape index: {}]   ;;  %s626_s2 = inlined_call_operand.vmem [shape: f32[1,16], index: 2, kind: input, shape index: {}]   ;;  %s627_s3 = inlined_call_operand.vmem [shape: f32[2,4,8,16], index: 3, kind: output, shape index: {}]  }
   0x1   :  { %s562_s14 = smov 0   ;;  %s564_s15 = smov 0  }
   0x2   :  { %s566_s16 = smov 0  }
   0x3 LB: > { %s28_s17 = sadd.s32 1, %s526_s14  ;;  %s32_s18 = sadd.s32 1, %s530_s15  ;;  %s534_s16 = sphi %s566_s16, %s13_s16   ;;  %s530_s15 = sphi %s564_s15, %s631_s15   ;;  %s526_s14 = sphi %s562_s14, %s630_s14   ;;  %s522_s13 = sphi %s560_s13, %s629_s13   ;;  %s518_s12 = sphi %s558_s12, %s628_s12  }
   0x4   : > { %p30_p0 = scmp.ge.s32.totalorder %s28_s17, 4  ;;  %p427_p1 = scmp.ge.s32.totalorder %s534_s16, 1 }
   0x5   : > { %p170_p2 = scmp.lt.s32.totalorder %s534_s16, 9 }
   0x6   : > { %s633_s17 = smov (%p30_p0, %s28_s17), 0  ;;  %s635_s18 = smov (!%p30_p0, %s32_s18), %s530_s15 }
   0x7   : > { %p171_p3 = pnand %p427_p1, %p170_p2  ;;  %p34_p4 = scmp.ge.s32.totalorder %s635_s18, 2 }
   0x8   : > { %p206_p5 = scmp.lt.s32.totalorder (!%p171_p3), %s518_s12, 3  ;;  %p208_p6 = scmp.lt.s32.totalorder (!%p171_p3), %s522_s13, 1 }
   0x9   : > { %s637_s18 = smov (%p34_p4, %s635_s18), 0  ;;  %174 = sbr.rel (%p171_p3) target bundleno = 239 (0xef), region = 32 }
   0xe   : > { %v232_v0 = vld [vmem:[%s625_s1 + $0x18] sm:$0xff]  ;;  %v536_v1 = vmov 0.0   ;;  %v231_v2 = vld [vmem:[%s625_s1 + $0x10] sm:$0xff]  ;;  %vm537_vm0 = vmmov 0   ;;  %s639_s12 = smov (!%p206_p5, %s518_s12), 3  ;;  %v230_v3 = vld [vmem:[%s625_s1 + $0x8] sm:$0xff] }
   0xf   : > { %441 = vmatprep.subr.mxu0 %v536_v1  ;;  %449 = vmatprep.mubr.msk.f32.mxu0 %vm537_vm0, %v536_v1  ;;  %s641_s13 = smov (!%p208_p6, %s522_s13), 1  ;;  %s428_s25 = sshll.u32 %s639_s12, 1  ;;  %v229_v4 = vld [vmem:[%s625_s1] sm:$0xff]  ;;  %vm240_vm1 = vcmask 261120   ;;  %vm319_vm2 = vcmask 130048  }
  0x10   : > { %442 = vmatpush3.msra.mxu0 %v232_v0  ;;  %s214_s28 = sadd.s32 %s428_s25, %s641_s13  ;;  %s430_s29 = sshll.u32 %s641_s13, 2  ;;  %v432_v6 = vld [vmem:[%s626_s2] ss:$0 sm:$0xff] }
  0x11   : > { %443 = vmatprep.subr.mxu0 %v536_v1  ;;  %s429_s30 = sshll.u32 %s214_s28, 3  ;;  %s225_s4 = sadd.s32 %s430_s29, %s639_s12 }
  0x12   : > { %444 = vmatpush3.msra.mxu0 %v231_v2  ;;  %s216_s7 = scalar_lea.vmem %s624_s0, %s429_s30  ;;  %s431_s10 = sshll.u32 %s225_s4, 3 }
  0x13   : > { %445 = vmatprep.subr.mxu0 %v536_v1  ;;  %v228_v5 = vld [vmem:[%s216_s7] sm:$0xff]  ;;  %s227_s13 = scalar_lea.vmem %s627_s3, %s431_s10 }
  0x14   : > { %446 = vmatpush3.msra.mxu0 %v230_v3 }
  0x15   : > { %447 = vmatprep.subr.mxu0 %v536_v1 }
  0x16   : > { %448 = vmatpush3.msra.mxu0 %v229_v4 }
  0x17   : > { %450 = vmatmul.mubr.msk.f32.vlgmr.msra.gmra.mxu0 %vm240_vm1, %v228_v5 }
  0xd7   : > { %v310_v7 = vpop.f32.mrf.mxu0 }
  0xd8   : > { %v311_v8 = vadd.f32 %v432_v6, %v310_v7 }
  0xd9   : > { %v451_v9 = vpop.f32.mrf.mxu0 }
  0xda   : > { %v315_v10 = vmul.f32 0.70710677, %v311_v8  ;;  %v314_v12 = vmul.f32 0.5, %v311_v8 }
  0xdc   : > { %494 = verf.f32 %v315_v10 }
  0xe9   : > { %v495_v11 = vpop.eup %494 }
  0xea   : > { %v317_v13 = vadd.f32 1.0, %v495_v11 }
  0xec   : > { %v318_v14 = vmul.f32 %v317_v13, %v314_v12 }
  0xee   : > { %320 = vst.msk [vmem:[%s227_s13] sm:$0xff] %vm319_vm2, %v318_v14 }
  0xef PF: > { %s13_s16 = sadd.s32 1, %s534_s16   ;;  %s628_s12 = smov %s526_s14 }
  0xf0   : > { %p10_p7 = scmp.ge.s32.totalorder %s13_s16, 10   ;;  %s629_s13 = smov %s530_s15 }
  0xf1   : > { %s630_s14 = smov %s633_s17  ;;  %s631_s15 = smov %s637_s18 }
  0xf2   :  { %12 = sbr.rel (!%p10_p7) target bundleno = 3 (0x3), region = 62 }

// kernel: ap_glue_forward.3
= control target key start
LH: loop header
LB: loop body
LE: loop exit
PB: predicated region body
PF: predicated region fallthrough
CT: control target
= control target key end

     0   :  { %v361_v30 = vmov 1983009808   ;;  %v92_v32 = vlaneseq  ;;  %s584_s0 = inlined_call_operand.vmem [shape: f32[2,512], index: 0, kind: input, shape index: {}]   ;;  %s585_s1 = inlined_call_operand.vmem [shape: f32[512,3], index: 1, kind: input, shape index: {}]   ;;  %s586_s2 = inlined_call_operand.vmem [shape: f32[1,3], index: 2, kind: input, shape index: {}]   ;;  %s587_s3 = inlined_call_operand.hbm [shape: f32[2,3], index: 3, kind: output, shape index: {}]  }
   0x1   :  { %v47_v0 = vld [vmem:[%s585_s1 + $0xf8] sm:$0xff]  ;;  %v46_v4 = vld [vmem:[%s585_s1 + $0xf0] sm:$0xff]  ;;  %v45_v8 = vld [vmem:[%s585_s1 + $0xe8] sm:$0xff]  ;;  %v90_v31 = vunpack.c.l.s4 %v361_v30 }
   0x2   :  { %v79_v1 = vld [vmem:[%s585_s1 + $0x1f8] sm:$0xff]  ;;  %266 = vmatprep.subr.mxu0 %v47_v0  ;;  %v78_v5 = vld [vmem:[%s585_s1 + $0x1f0] sm:$0xff]  ;;  %v77_v9 = vld [vmem:[%s585_s1 + $0x1e8] sm:$0xff]  ;;  %v93_v42 = vshrl.u32 %v92_v32, 7 }
   0x3   :  { %v31_v2 = vld [vmem:[%s585_s1 + $0x78] sm:$0xff]  ;;  %301 = vmatprep.subr.mxu1 %v79_v1  ;;  %v30_v6 = vld [vmem:[%s585_s1 + $0x70] sm:$0xff]  ;;  %v29_v10 = vld [vmem:[%s585_s1 + $0x68] sm:$0xff]  ;;  %v91_v41 = vunpack.c.0.s8 %v90_v31 }
   0x4   :  { %v63_v3 = vld [vmem:[%s585_s1 + $0x178] sm:$0xff]  ;;  %267 = vmatpush3.msra.mxu0 %v31_v2  ;;  %v62_v7 = vld [vmem:[%s585_s1 + $0x170] sm:$0xff]  ;;  %v61_v11 = vld [vmem:[%s585_s1 + $0x168] sm:$0xff] }
   0x5   :  { %302 = vmatpush3.msra.mxu1 %v63_v3  ;;  %268 = vmatprep.subr.mxu0 %v46_v4  ;;  %v44_v12 = vld [vmem:[%s585_s1 + $0xe0] sm:$0xff]  ;;  %v43_v16 = vld [vmem:[%s585_s1 + $0xd8] sm:$0xff]  ;;  %v42_v20 = vld [vmem:[%s585_s1 + $0xd0] sm:$0xff]  ;;  %v94_v52 = vsub.s32 %v91_v41, %v93_v42 }
   0x6   :  { %303 = vmatprep.subr.mxu1 %v78_v5  ;;  %269 = vmatpush3.msra.mxu0 %v30_v6  ;;  %v76_v13 = vld [vmem:[%s585_s1 + $0x1e0] sm:$0xff]  ;;  %v75_v17 = vld [vmem:[%s585_s1 + $0x1d8] sm:$0xff]  ;;  %v74_v21 = vld [vmem:[%s585_s1 + $0x1d0] sm:$0xff] }
   0x7   :  { %304 = vmatpush3.msra.mxu1 %v62_v7  ;;  %270 = vmatprep.subr.mxu0 %v45_v8  ;;  %v28_v14 = vld [vmem:[%s585_s1 + $0x60] sm:$0xff]  ;;  %v27_v18 = vld [vmem:[%s585_s1 + $0x58] sm:$0xff]  ;;  %v26_v22 = vld [vmem:[%s585_s1 + $0x50] sm:$0xff] }
   0x8   :  { %305 = vmatprep.subr.mxu1 %v77_v9  ;;  %v60_v15 = vld [vmem:[%s585_s1 + $0x160] sm:$0xff]  ;;  %271 = vmatpush3.msra.mxu0 %v29_v10  ;;  %v59_v19 = vld [vmem:[%s585_s1 + $0x158] sm:$0xff]  ;;  %v58_v23 = vld [vmem:[%s585_s1 + $0x150] sm:$0xff] }
   0x9   :  { %306 = vmatpush3.msra.mxu1 %v61_v11  ;;  %272 = vmatprep.subr.mxu0 %v44_v12  ;;  %v41_v24 = vld [vmem:[%s585_s1 + $0xc8] sm:$0xff]  ;;  %v40_v28 = vld [vmem:[%s585_s1 + $0xc0] sm:$0xff]  ;;  %v39_v35 = vld [vmem:[%s585_s1 + $0xb8] sm:$0xff] }
   0xa   :  { %307 = vmatprep.subr.mxu1 %v76_v13  ;;  %273 = vmatpush3.msra.mxu0 %v28_v14  ;;  %v73_v25 = vld [vmem:[%s585_s1 + $0x1c8] sm:$0xff]  ;;  %v72_v29 = vld [vmem:[%s585_s1 + $0x1c0] sm:$0xff]  ;;  %v71_v36 = vld [vmem:[%s585_s1 + $0x1b8] sm:$0xff] }
   0xb   :  { %308 = vmatpush3.msra.mxu1 %v60_v15  ;;  %274 = vmatprep.subr.mxu0 %v43_v16  ;;  %v25_v26 = vld [vmem:[%s585_s1 + $0x48] sm:$0xff]  ;;  %v24_v33 = vld [vmem:[%s585_s1 + $0x40] sm:$0xff]  ;;  %v23_v37 = vld [vmem:[%s585_s1 + $0x38] sm:$0xff] }
   0xc   :  { %309 = vmatprep.subr.mxu1 %v75_v17  ;;  %275 = vmatpush3.msra.mxu0 %v27_v18  ;;  %v57_v27 = vld [vmem:[%s585_s1 + $0x148] sm:$0xff]  ;;  %v56_v34 = vld [vmem:[%s585_s1 + $0x140] sm:$0xff]  ;;  %v55_v38 = vld [vmem:[%s585_s1 + $0x138] sm:$0xff] }
   0xd   :  { %310 = vmatpush3.msra.mxu1 %v59_v19  ;;  %276 = vmatprep.subr.mxu0 %v42_v20  ;;  %v38_v39 = vld [vmem:[%s585_s1 + $0xb0] sm:$0xff]  ;;  %v37_v45 = vld [vmem:[%s585_s1 + $0xa8] sm:$0xff]  ;;  %v36_v49 = vld [vmem:[%s585_s1 + $0xa0] sm:$0xff] }
   0xe   :  { %311 = vmatprep.subr.mxu1 %v74_v21  ;;  %277 = vmatpush3.msra.mxu0 %v26_v22  ;;  %v70_v40 = vld [vmem:[%s585_s1 + $0x1b0] sm:$0xff]  ;;  %v69_v46 = vld [vmem:[%s585_s1 + $0x1a8] sm:$0xff]  ;;  %v68_v50 = vld [vmem:[%s585_s1 + $0x1a0] sm:$0xff] }
   0xf   :  { %312 = vmatpush3.msra.mxu1 %v58_v23  ;;  %278 = vmatprep.subr.mxu0 %v41_v24  ;;  %v22_v43 = vld [vmem:[%s585_s1 + $0x30] sm:$0xff]  ;;  %v21_v47 = vld [vmem:[%s585_s1 + $0x28] sm:$0xff]  ;;  %v20_v51 = vld [vmem:[%s585_s1 + $0x20] sm:$0xff] }
  0x10   :  { %313 = vmatprep.subr.mxu1 %v73_v25  ;;  %279 = vmatpush3.msra.mxu0 %v25_v26  ;;  %v54_v44 = vld [vmem:[%s585_s1 + $0x130] sm:$0xff]  ;;  %v53_v48 = vld [vmem:[%s585_s1 + $0x128] sm:$0xff]  ;;  %v52_v53 = vld [vmem:[%s585_s1 + $0x120] sm:$0xff] }
  0x11   :  { %314 = vmatpush3.msra.mxu1 %v57_v27  ;;  %280 = vmatprep.subr.mxu0 %v40_v28  ;;  %v15_v54 = vld [vmem:[%s584_s0] sm:$0xff] }
  0x12   :  { %315 = vmatprep.subr.mxu1 %v72_v29  ;;  %281 = vmatpush3.msra.mxu0 %v24_v33 }
  0x13   :  { %316 = vmatpush3.msra.mxu1 %v56_v34  ;;  %282 = vmatprep.subr.mxu0 %v39_v35 }
  0x14   :  { %317 = vmatprep.subr.mxu1 %v71_v36  ;;  %283 = vmatpush3.msra.mxu0 %v23_v37 }
  0x15   :  { %318 = vmatpush3.msra.mxu1 %v55_v38  ;;  %284 = vmatprep.subr.mxu0 %v38_v39 }
  0x16   :  { %319 = vmatprep.subr.mxu1 %v70_v40  ;;  %285 = vmatpush3.msra.mxu0 %v22_v43 }
  0x17   :  { %320 = vmatpush3.msra.mxu1 %v54_v44  ;;  %286 = vmatprep.subr.mxu0 %v37_v45 }
  0x18   :  { %321 = vmatprep.subr.mxu1 %v69_v46 }
  0x19   :  { %8 = vsyncpa [#allocation3], 0  ;;  %287 = vmatpush3.msra.mxu0 %v21_v47  ;;  %322 = vmatpush3.msra.mxu1 %v53_v48  ;;  %v35_v55 = vld [vmem:[%s585_s1 + $0x98] sm:$0xff]  ;;  %v88_v57 = vcombine.high %v15_v54, %v15_v54  ;;  %v34_v60 = vld [vmem:[%s585_s1 + $0x90] sm:$0xff]  ;;  %v95_v62 = vrot.slane %v15_v54, %v94_v52  ;;  %s362_s8 = smov [#allocation2]   ;;  %vm249_vm0 = vcmask 17408  }
  0x1a   :  { %v67_v56 = vld [vmem:[%s585_s1 + $0x198] sm:$0xff]  ;;  %288 = vmatprep.subr.mxu0 %v36_v49  ;;  %323 = vmatprep.subr.mxu1 %v68_v50  ;;  %v66_v61 = vld [vmem:[%s585_s1 + $0x190] sm:$0xff]  ;;  %v33_v2 = vld [vmem:[%s585_s1 + $0x88] sm:$0xff]  ;;  %s257_s0 = sshll.u32 %s362_s8, 4  ;;  %s258_s0 = int_to_ptr.vmem [resolvable:$true] %s257_s0 }
  0x1b   :  { %v19_v58 = vld [vmem:[%s585_s1 + $0x18] sm:$0xff]  ;;  %289 = vmatpush3.msra.mxu0 %v20_v51  ;;  %324 = vmatpush3.msra.mxu1 %v52_v53  ;;  %v18_v63 = vld [vmem:[%s585_s1 + $0x10] sm:$0xff]  ;;  %v102_v1 = vrot.slane %v88_v57, %v94_v52  ;;  %v65_v3 = vld [vmem:[%s585_s1 + $0x188] sm:$0xff]  ;;  %v103_v8 = vcombine.high %v95_v62, %v95_v62  ;;  %p344_p1 = scmp.lt.s32.totalorder %s258_s0, %s258_s0 }
  0x1c   :  { %v51_v59 = vld [vmem:[%s585_s1 + $0x118] sm:$0xff]  ;;  %290 = vmatprep.subr.mxu0 %v35_v55  ;;  %325 = vmatprep.subr.mxu1 %v67_v56  ;;  %v50_v0 = vld [vmem:[%s585_s1 + $0x110] sm:$0xff]  ;;  %v17_v4 = vld [vmem:[%s585_s1 + $0x8] sm:$0xff] }
  0x1d   :  { %291 = vmatpush3.msra.mxu0 %v19_v58  ;;  %326 = vmatpush3.msra.mxu1 %v51_v59  ;;  %v49_v5 = vld [vmem:[%s585_s1 + $0x108] sm:$0xff]  ;;  %v32_v6 = vld [vmem:[%s585_s1 + $0x80] sm:$0xff]  ;;  %v104_v10 = vcombine.high %v102_v1, %v102_v1 }
  0x1e   :  { %292 = vmatprep.subr.mxu0 %v34_v60  ;;  %327 = vmatprep.subr.mxu1 %v66_v61  ;;  %v64_v7 = vld [vmem:[%s585_s1 + $0x180] sm:$0xff] }
  0x1f   :  { %293 = vmatpush3.msra.mxu0 %v18_v63  ;;  %328 = vmatpush3.msra.mxu1 %v50_v0  ;;  %v16_v9 = vld [vmem:[%s585_s1] sm:$0xff] }
  0x20   :  { %294 = vmatprep.subr.mxu0 %v33_v2  ;;  %329 = vmatprep.subr.mxu1 %v65_v3  ;;  %v48_v11 = vld [vmem:[%s585_s1 + $0x100] sm:$0xff]  ;;  %s339_s1 = scalar_lea.vmem %s258_s0, 32 }
  0x21   :  { %295 = vmatpush3.msra.mxu0 %v17_v4  ;;  %330 = vmatpush3.msra.mxu1 %v49_v5  ;;  %v265_v14 = vld [vmem:[%s586_s2] ss:$0 sm:$0xff]  ;;  %p340_p0 = scmp.ne.s32.totalorder %s258_s0, %s339_s1  ;;  %p345_p2 = scmp.lt.s32.totalorder %s339_s1, %s339_s1 }
  0x22   :  { %296 = vmatprep.subr.mxu0 %v32_v6  ;;  %331 = vmatprep.subr.mxu1 %v64_v7 }
  0x23   :  { %297 = vmatpush3.msra.mxu0 %v16_v9  ;;  %173 = vmatprep.mubr.f32.mxu0 %v103_v8  ;;  %p346_p3 = por %p345_p2, %p344_p1 }
  0x24   :  { %332 = vmatpush3.msra.mxu1 %v48_v11  ;;  %243 = vmatprep.mubr.f32.mxu1 %v104_v10 }
  0x25   :  { %174 = vmatmul.mubr.f32.vlgmr.msra.gmra.mxu0 %v95_v62  ;;  %244 = vmatmul.mubr.f32.vlgmr.msra.gmra.mxu1 %v102_v1  ;;  %p347_p4 = pnand %p346_p3, %p340_p0 }
  0xe5   :  { %v298_v12 = vpop.f32.mrf.mxu0  ;;  %v333_v13 = vpop.f32.mrf.mxu1 }
  0xe7   :  { %v299_v15 = vpop.f32.mrf.mxu0  ;;  %v334_v16 = vpop.f32.mrf.mxu1 }
  0xe8   :  { %v300_v17 = vadd.f32 %v299_v15, %v298_v12  ;;  %v335_v19 = vadd.f32 %v334_v16, %v333_v13 }
  0xea   :  { %v176_v18 = vadd.f32 %v300_v17, %v265_v14 }
  0xec   :  { %v246_v20 = vadd.f32 %v335_v19, %v176_v18 }
  0xee   :  { %250 = vst.msk [vmem:[#allocation2] sm:$0x3] %vm249_vm0, %v246_v20 }
  0xef   :  { %350 = shalt.err (!%p347_p4)
}
  0xf0   :  { %260 = dma.vmem_to_hbm [thread:$0]  %s258_s0, 32, %s587_s3, [#allocation3]  }
  0xf1   :  { %359 = dma.done.wait [#allocation3], 32  }
  0xf2   :  { %360 = vsyncadd [#allocation3], 4294967264 }
  0xf3   :  { %264 = vsyncpa [#allocation3], 1 }

</bundles_post_ra>
